<compile_context>
chip_gen: v5e
topology: v5e:2x2
jax: 0.10.0
libtpu: 0.0.40
codegen_flags: <defaults>
</compile_context>

<pallas_src>
import numpy as np
import jax
import jax.numpy as jnp
from jax.experimental import pallas as pl
from jax.experimental.pallas import tpu as pltpu


def gn_kernel(src_ref, dst_ref, eattr_ref, x_ref, batch_ref, w_ref, b_ref,
              out_ref, h_scr, aggr_scr):
    f32 = jnp.float32
    l = pl.program_id(0)                      # layer index (0..2)
    t = pl.program_id(1)                      # edge-tile index (reduction axis)
    n_layers = pl.num_programs(0)
    n_tiles = pl.num_programs(1)

    N, H = h_scr.shape
    TE = eattr_ref.shape[0]
    B = out_ref.shape[0]

    # ---- init: h <- x at the very first step, aggr <- 0 at each layer start ----
    @pl.when((l == 0) & (t == 0))
    def _init_h():
        h_scr[...] = x_ref[...]

    @pl.when(t == 0)
    def _init_aggr():
        aggr_scr[...] = jnp.zeros_like(aggr_scr)

    # ---- per edge tile: gather -> message -> scatter-add (both matmuls canonical) ----
    h = h_scr[...]                                                     # [N, H]
    # Gather one-hot [TE, N]: src arrives as a [TE, 1] column (sublane-oriented),
    # so only the (unavoidable) lane broadcast remains.
    gath = (jax.lax.broadcasted_iota(jnp.int32, (TE, N), 1)
            == src_ref[...]).astype(f32)
    xj = jnp.dot(gath, h, preferred_element_type=f32)                  # [TE, H]
    msg = jnp.maximum(xj + eattr_ref[...], 0.0)                        # ReLU(x_src + e)
    # Scatter one-hot [N, TE]: lane-dense compare against the [1, TE] dst row,
    # making the scatter a plain [N,TE]@[TE,H] matmul (no LHS-transposed dot_general).
    dsth = (jax.lax.broadcasted_iota(jnp.int32, (N, TE), 0)
            == dst_ref[...]).astype(f32)
    aggr_scr[...] += jnp.dot(dsth, msg, preferred_element_type=f32)    # [N, H]

    # ---- edge reduction done: dense layer on the VPU (K = H = 6, unrolled FMA) ----
    @pl.when(t == n_tiles - 1)
    def _dense():
        z = h_scr[...] + aggr_scr[...]                                 # [N, H]
        w = w_ref[l]                                                   # [H, H]
        b = b_ref[l]                                                   # [1, H]
        acc = jnp.zeros((N, H), f32) + b
        for k in range(H):                                             # static unroll
            acc = acc + z[:, k:k + 1] * w[k:k + 1, :]
        # ReLU after conv1/conv2 only.
        h_scr[...] = jnp.where(l < n_layers - 1, jnp.maximum(acc, 0.0), acc)

    # ---- final layer: global mean pool + lin (column 0 of the padded slab) ----
    @pl.when((l == n_layers - 1) & (t == n_tiles - 1))
    def _head():
        hN = h_scr[...]                                                # [N, H]
        pool_mask = (jax.lax.broadcasted_iota(jnp.int32, (B, N), 0)
                     == batch_ref[...]).astype(f32)                    # [B, N]
        counts = jnp.sum(pool_mask, axis=1, keepdims=True)             # [B, 1]
        # Empty graphs give 0 instead of the NaN the torch reference would produce.
        pool = pool_mask / jnp.maximum(counts, 1.0)
        pooled = jnp.dot(pool, hN, preferred_element_type=f32)         # [B, H]
        w_lin = w_ref[3]                                               # [H, H] (col 0 real)
        b_lin = b_ref[3]                                               # [1, H]
        o = jnp.zeros((B, H), f32) + b_lin
        for k in range(H):
            o = o + pooled[:, k:k + 1] * w_lin[k:k + 1, :]
        out_ref[...] = o                     # wider [B, H] store; column 0 is the output


def pack_params(params):
    """One-time packing of the 8 parameter tensors into 2 slabs (hoisted out of
    the per-call path).  The final Linear(H, 1) is zero-padded into column 0 of
    an [H, H] slot so a single [4, H, H] / [4, 1, H] pair covers all layers."""
    (w1, b1), (w2, b2), (w3, b3), (wl, bl) = params
    H = w1.shape[1]
    assert w1.shape[0] == H, "GINEConv w/o edge_dim forces hidden == feature dim"
    f32 = jnp.float32
    wl_pad = jnp.zeros((H, H), f32).at[:, :wl.shape[1]].set(wl)
    bl_pad = jnp.zeros((1, H), f32).at[:, :bl.shape[1]].set(bl)
    wslab = jnp.stack([w1, w2, w3, wl_pad], axis=0).astype(f32)        # [4, H, H]
    bslab = jnp.stack([b1, b2, b3, bl_pad], axis=0).astype(f32)        # [4, 1, H]
    return wslab, bslab


def gn_forward(x, edge_index, edge_attr, batch, wslab, bslab, num_graphs):
    N, F = x.shape
    E = edge_attr.shape[0]
    H = wslab.shape[1]
    B = int(num_graphs)
    assert F == H
    f32 = jnp.float32

    # src must sit along sublanes (column) to build the canonical [E, N] gather
    # one-hot without an in-kernel relayout; dst and batch are consumed lane-dense
    # as rows.  These tiny reshapes are the only per-call wrapper ops.
    src_col = edge_index[0].astype(jnp.int32).reshape(E, 1)            # [E, 1]
    dst_row = edge_index[1].astype(jnp.int32).reshape(1, E)            # [1, E]
    batch_row = batch.astype(jnp.int32).reshape(1, N)                  # [1, N]

    # Edge-tile size: full E for small graphs, lane-dense 512-wide tiles otherwise.
    MAX_TE = 512
    if E <= MAX_TE:
        TE = E
    else:
        # TODO(synk): pad ragged E to a multiple of MAX_TE with sentinel (>= N) indices.
        assert E % MAX_TE == 0
        TE = MAX_TE
    KT = E // TE
    L = 3  # conv layers

    grid_spec = pltpu.PrefetchScalarGridSpec(
        num_scalar_prefetch=0,
        grid=(L, KT),                           # edge axis = reduction, last in grid
        in_specs=[
            pl.BlockSpec((TE, 1), lambda l, t: (t, 0)),       # src column tile
            pl.BlockSpec((1, TE), lambda l, t: (0, t)),       # dst row tile
            pl.BlockSpec((TE, F), lambda l, t: (t, 0)),       # edge_attr tile
            pl.BlockSpec((N, F), lambda l, t: (0, 0)),        # x (resident)
            pl.BlockSpec((1, N), lambda l, t: (0, 0)),        # batch row (resident)
            pl.BlockSpec((4, H, H), lambda l, t: (0, 0, 0)),  # packed weights
            pl.BlockSpec((4, 1, H), lambda l, t: (0, 0, 0)),  # packed biases
        ],
        out_specs=pl.BlockSpec((B, H), lambda l, t: (0, 0)),
        scratch_shapes=[pltpu.VMEM((N, H), f32),    # h: resident node features
                        pltpu.VMEM((N, H), f32)],   # aggr: per-layer accumulator
    )
    # TODO(synk): tile the node axis and add a "parallel" graph/node grid axis
    # (v7x megacore) once N no longer fits VMEM-resident.
    out = pl.pallas_call(
        gn_kernel,
        out_shape=jax.ShapeDtypeStruct((B, H), f32),
        grid_spec=grid_spec,
        compiler_params=pltpu.CompilerParams(
            dimension_semantics=("arbitrary", "arbitrary")),
    )(src_col, dst_row, edge_attr, x, batch_row, wslab, bslab)
    return out[:, :1]                       # column 0 of the zero-padded lin output


def ref_forward(x, edge_index, edge_attr, batch, params, num_graphs):
    """Pure-JAX reference of the PyTorch forward pass."""
    src, dst = edge_index[0], edge_index[1]
    N = x.shape[0]
    (w1, b1), (w2, b2), (w3, b3), (wl, bl) = params
    h = x
    for w, b, act in ((w1, b1, True), (w2, b2, True), (w3, b3, False)):
        msg = jax.nn.relu(h[src] + edge_attr)
        aggr = jax.ops.segment_sum(msg, dst, num_segments=N)
        h = (h + aggr) @ w + b
        if act:
            h = jax.nn.relu(h)
    counts = jax.ops.segment_sum(jnp.ones((N,), jnp.float32), batch,
                                 num_segments=num_graphs)
    pooled = jax.ops.segment_sum(h, batch, num_segments=num_graphs) / counts[:, None]
    return pooled @ wl + bl


def init_linear(key, fan_in, fan_out):
    """Deterministic nn.Linear-style init; weight stored as [in, out]."""
    kw, kb = jax.random.split(key)
    bound = 1.0 / np.sqrt(fan_in)
    w = jax.random.uniform(kw, (fan_in, fan_out), jnp.float32, -bound, bound)
    b = jax.random.uniform(kb, (1, fan_out), jnp.float32, -bound, bound)
    return w, b


if __name__ == "__main__":
    key = jax.random.PRNGKey(0)
    N, E, B = 16, 32, 2
    F = 6                      # node / edge feature dim
    hidden = 6                 # GINEConv (no edge_dim) forces hidden == edge dim

    k_x, k_e, k_src, k_dst, k1, k2, k3, k4 = jax.random.split(key, 8)
    x = jax.random.normal(k_x, (N, F), jnp.float32)
    edge_attr = jax.random.normal(k_e, (E, F), jnp.float32)
    src = jax.random.randint(k_src, (E,), 0, N, jnp.int32)
    dst = jax.random.randint(k_dst, (E,), 0, N, jnp.int32)
    edge_index = jnp.stack([src, dst], axis=0)                     # [2, E]
    batch = jnp.concatenate([jnp.zeros((N // 2,), jnp.int32),
                             jnp.ones((N - N // 2,), jnp.int32)])  # [N]

    params = (
        init_linear(k1, F, hidden),       # conv1.nn : Linear(6, hidden)
        init_linear(k2, hidden, hidden),  # conv2.nn : Linear(hidden, hidden)
        init_linear(k3, hidden, hidden),  # conv3.nn : Linear(hidden, hidden)
        init_linear(k4, hidden, 1),       # lin      : Linear(hidden, 1)
    )
    wslab, bslab = pack_params(params)    # hoisted: packed once, reused every call

    fwd = jax.jit(gn_forward, static_argnums=(6,))
    out = fwd(x, edge_index, edge_attr, batch, wslab, bslab, B)
    out = jax.block_until_ready(out)

    ref = ref_forward(x, edge_index, edge_attr, batch, params, B)
    np.testing.assert_allclose(np.asarray(out), np.asarray(ref),
                               rtol=1e-5, atol=1e-5)
    print("KERNEL_OK")
</pallas_src>

<mosaic_0001>
module attributes {stable_mosaic.version = 11 : i64} {
  func.func @gn_kernel(%arg0: i32, %arg1: i32, %arg2: memref<32x1xi32, #tpu.memory_space<vmem>>, %arg3: memref<1x32xi32, #tpu.memory_space<vmem>>, %arg4: memref<32x6xf32, #tpu.memory_space<vmem>>, %arg5: memref<16x6xf32, #tpu.memory_space<vmem>>, %arg6: memref<1x16xi32, #tpu.memory_space<vmem>>, %arg7: memref<4x6x6xf32, #tpu.memory_space<vmem>>, %arg8: memref<4x1x6xf32, #tpu.memory_space<vmem>>, %arg9: memref<2x6xf32, #tpu.memory_space<vmem>>, %arg10: memref<16x6xf32, #tpu.memory_space<vmem>>, %arg11: memref<16x6xf32, #tpu.memory_space<vmem>>) attributes {dimension_semantics = [#tpu.dimension_semantics<arbitrary>, #tpu.dimension_semantics<arbitrary>], iteration_bounds = array<i64: 3, 1>, scalar_prefetch = 0 : i64, scratch_operands = 2 : i64, tpu.core_type = #tpu.core_type<tc>, window_params = [{transform_indices = @transform_0, window_bounds = array<i64: 32, 1>}, {transform_indices = @transform_1, window_bounds = array<i64: 1, 32>}, {transform_indices = @transform_2, window_bounds = array<i64: 32, 6>}, {pipeline_mode = #tpu.pipeline_mode<synchronous>, transform_indices = @transform_3, window_bounds = array<i64: 16, 6>}, {pipeline_mode = #tpu.pipeline_mode<synchronous>, transform_indices = @transform_4, window_bounds = array<i64: 1, 16>}, {pipeline_mode = #tpu.pipeline_mode<synchronous>, transform_indices = @transform_5, window_bounds = array<i64: 4, 6, 6>}, {pipeline_mode = #tpu.pipeline_mode<synchronous>, transform_indices = @transform_6, window_bounds = array<i64: 4, 1, 6>}, {pipeline_mode = #tpu.pipeline_mode<synchronous>, transform_indices = @transform_7, window_bounds = array<i64: 2, 6>}]} {
    %c0_i32 = arith.constant 0 : i32
    %0 = arith.cmpi eq, %arg0, %c0_i32 : i32
    %c0_i32_0 = arith.constant 0 : i32
    %1 = arith.cmpi eq, %arg1, %c0_i32_0 : i32
    %2 = arith.andi %0, %1 : i1
    %3 = arith.extui %2 : i1 to i32
    %c0_i32_1 = arith.constant 0 : i32
    %4 = arith.cmpi ne, %3, %c0_i32_1 : i32
    scf.if %4 {
      %c0_21 = arith.constant 0 : index
      %c0_22 = arith.constant 0 : index
      %38 = vector.load %arg5[%c0_21, %c0_22] : memref<16x6xf32, #tpu.memory_space<vmem>>, vector<16x6xf32>
      %c0_23 = arith.constant 0 : index
      %c0_24 = arith.constant 0 : index
      %39 = vector.load %arg10[%c0_23, %c0_24] : memref<16x6xf32, #tpu.memory_space<vmem>>, vector<16x6xf32>
      tpu.vector_store %arg10[%c0_23, %c0_24], %38 {strides = array<i32>} : memref<16x6xf32, #tpu.memory_space<vmem>>, vector<16x6xf32>,
    } else {
    }
    %c0_i32_2 = arith.constant 0 : i32
    %5 = arith.cmpi eq, %arg1, %c0_i32_2 : i32
    %6 = arith.extui %5 : i1 to i32
    %c0_i32_3 = arith.constant 0 : i32
    %7 = arith.cmpi ne, %6, %c0_i32_3 : i32
    scf.if %7 {
      %cst_21 = arith.constant 0.000000e+00 : f32
      %38 = vector.broadcast %cst_21 : f32 to vector<16x6xf32>
      %c0_22 = arith.constant 0 : index
      %c0_23 = arith.constant 0 : index
      %39 = vector.load %arg11[%c0_22, %c0_23] : memref<16x6xf32, #tpu.memory_space<vmem>>, vector<16x6xf32>
      tpu.vector_store %arg11[%c0_22, %c0_23], %38 {strides = array<i32>} : memref<16x6xf32, #tpu.memory_space<vmem>>, vector<16x6xf32>,
    } else {
    }
    %c0 = arith.constant 0 : index
    %c0_4 = arith.constant 0 : index
    %8 = vector.load %arg10[%c0, %c0_4] : memref<16x6xf32, #tpu.memory_space<vmem>>, vector<16x6xf32>
    %9 = tpu.iota {dimensions = array<i32: 1>} : vector<32x16xi32>
    %c0_5 = arith.constant 0 : index
    %c0_6 = arith.constant 0 : index
    %10 = vector.load %arg2[%c0_5, %c0_6] : memref<32x1xi32, #tpu.memory_space<vmem>>, vector<32x1xi32>
    %11 = vector.broadcast %10 : vector<32x1xi32> to vector<32x16xi32>
    %12 = arith.cmpi eq, %9, %11 : vector<32x16xi32>
    %13 = arith.extui %12 : vector<32x16xi1> to vector<32x16xi32>
    %14 = arith.sitofp %13 : vector<32x16xi32> to vector<32x16xf32>
    %cst = arith.constant dense<0.000000e+00> : vector<32x6xf32>
    %15 = tpu.matmul %14, %8, %cst {dimension_numbers = #tpu.dot_dimension_numbers<[1], [0], [0], [1], [0, 0, 1, 1], [], []>} : vector<32x16xf32>, vector<16x6xf32>, vector<32x6xf32> -> vector<32x6xf32>
    %c0_7 = arith.constant 0 : index
    %c0_8 = arith.constant 0 : index
    %16 = vector.load %arg4[%c0_7, %c0_8] : memref<32x6xf32, #tpu.memory_space<vmem>>, vector<32x6xf32>
    %17 = arith.addf %15, %16 : vector<32x6xf32>
    %cst_9 = arith.constant 0.000000e+00 : f32
    %18 = vector.broadcast %cst_9 : f32 to vector<32x6xf32>
    %19 = arith.maximumf %17, %18 : vector<32x6xf32>
    %20 = tpu.iota {dimensions = array<i32: 0>} : vector<16x32xi32>
    %c0_10 = arith.constant 0 : index
    %c0_11 = arith.constant 0 : index
    %21 = vector.load %arg3[%c0_10, %c0_11] : memref<1x32xi32, #tpu.memory_space<vmem>>, vector<1x32xi32>
    %22 = vector.broadcast %21 : vector<1x32xi32> to vector<16x32xi32>
    %23 = arith.cmpi eq, %20, %22 : vector<16x32xi32>
    %24 = arith.extui %23 : vector<16x32xi1> to vector<16x32xi32>
    %25 = arith.sitofp %24 : vector<16x32xi32> to vector<16x32xf32>
    %c0_12 = arith.constant 0 : index
    %c0_13 = arith.constant 0 : index
    %26 = vector.load %arg11[%c0_12, %c0_13] : memref<16x6xf32, #tpu.memory_space<vmem>>, vector<16x6xf32>
    %cst_14 = arith.constant dense<0.000000e+00> : vector<16x6xf32>
    %27 = tpu.matmul %25, %19, %cst_14 {dimension_numbers = #tpu.dot_dimension_numbers<[1], [0], [0], [1], [0, 0, 1, 1], [], []>} : vector<16x32xf32>, vector<32x6xf32>, vector<16x6xf32> -> vector<16x6xf32>
    %28 = arith.addf %26, %27 : vector<16x6xf32>
    %c0_15 = arith.constant 0 : index
    %c0_16 = arith.constant 0 : index
    %29 = vector.load %arg11[%c0_15, %c0_16] : memref<16x6xf32, #tpu.memory_space<vmem>>, vector<16x6xf32>
    tpu.vector_store %arg11[%c0_15, %c0_16], %28 {strides = array<i32>} : memref<16x6xf32, #tpu.memory_space<vmem>>, vector<16x6xf32>,
    %c0_i32_17 = arith.constant 0 : i32
    %30 = arith.cmpi eq, %arg1, %c0_i32_17 : i32
    %31 = arith.extui %30 : i1 to i32
    %c0_i32_18 = arith.constant 0 : i32
    %32 = arith.cmpi ne, %31, %c0_i32_18 : i32
    scf.if %32 {
      %c0_21 = arith.constant 0 : index
      %c0_22 = arith.constant 0 : index
      %38 = vector.load %arg10[%c0_21, %c0_22] : memref<16x6xf32, #tpu.memory_space<vmem>>, vector<16x6xf32>
      %c0_23 = arith.constant 0 : index
      %c0_24 = arith.constant 0 : index
      %39 = vector.load %arg11[%c0_23, %c0_24] : memref<16x6xf32, #tpu.memory_space<vmem>>, vector<16x6xf32>
      %40 = arith.addf %38, %39 : vector<16x6xf32>
      %41 = arith.index_cast %arg0 : i32 to index
      %c0_25 = arith.constant 0 : index
      %c0_26 = arith.constant 0 : index
      %42 = vector.load %arg7[%41, %c0_25, %c0_26] : memref<4x6x6xf32, #tpu.memory_space<vmem>>, vector<1x6x6xf32>
      %43 = vector.shape_cast %42 : vector<1x6x6xf32> to vector<6x6xf32>
      %44 = arith.index_cast %arg0 : i32 to index
      %c0_27 = arith.constant 0 : index
      %c0_28 = arith.constant 0 : index
      %45 = vector.load %arg8[%44, %c0_27, %c0_28] : memref<4x1x6xf32, #tpu.memory_space<vmem>>, vector<1x1x6xf32>
      %46 = vector.shape_cast %45 : vector<1x1x6xf32> to vector<1x6xf32>
      %cst_29 = arith.constant 0.000000e+00 : f32
      %47 = vector.broadcast %cst_29 : f32 to vector<16x6xf32>
      %48 = vector.broadcast %46 : vector<1x6xf32> to vector<16x6xf32>
      %49 = arith.addf %47, %48 : vector<16x6xf32>
      %50 = vector.extract_strided_slice %40 {offsets = [0, 0], sizes = [16, 1], strides = [1, 1]} : vector<16x6xf32> to vector<16x1xf32>
      %51 = vector.extract_strided_slice %43 {offsets = [0, 0], sizes = [1, 6], strides = [1, 1]} : vector<6x6xf32> to vector<1x6xf32>
      %52 = vector.broadcast %50 : vector<16x1xf32> to vector<16x6xf32>
      %53 = vector.broadcast %51 : vector<1x6xf32> to vector<16x6xf32>
      %54 = arith.mulf %52, %53 : vector<16x6xf32>
      %55 = arith.addf %49, %54 : vector<16x6xf32>
      %56 = vector.extract_strided_slice %40 {offsets = [0, 1], sizes = [16, 1], strides = [1, 1]} : vector<16x6xf32> to vector<16x1xf32>
      %57 = vector.extract_strided_slice %43 {offsets = [1, 0], sizes = [1, 6], strides = [1, 1]} : vector<6x6xf32> to vector<1x6xf32>
      %58 = vector.broadcast %56 : vector<16x1xf32> to vector<16x6xf32>
      %59 = vector.broadcast %57 : vector<1x6xf32> to vector<16x6xf32>
      %60 = arith.mulf %58, %59 : vector<16x6xf32>
      %61 = arith.addf %55, %60 : vector<16x6xf32>
      %62 = vector.extract_strided_slice %40 {offsets = [0, 2], sizes = [16, 1], strides = [1, 1]} : vector<16x6xf32> to vector<16x1xf32>
      %63 = vector.extract_strided_slice %43 {offsets = [2, 0], sizes = [1, 6], strides = [1, 1]} : vector<6x6xf32> to vector<1x6xf32>
      %64 = vector.broadcast %62 : vector<16x1xf32> to vector<16x6xf32>
      %65 = vector.broadcast %63 : vector<1x6xf32> to vector<16x6xf32>
      %66 = arith.mulf %64, %65 : vector<16x6xf32>
      %67 = arith.addf %61, %66 : vector<16x6xf32>
      %68 = vector.extract_strided_slice %40 {offsets = [0, 3], sizes = [16, 1], strides = [1, 1]} : vector<16x6xf32> to vector<16x1xf32>
      %69 = vector.extract_strided_slice %43 {offsets = [3, 0], sizes = [1, 6], strides = [1, 1]} : vector<6x6xf32> to vector<1x6xf32>
      %70 = vector.broadcast %68 : vector<16x1xf32> to vector<16x6xf32>
      %71 = vector.broadcast %69 : vector<1x6xf32> to vector<16x6xf32>
      %72 = arith.mulf %70, %71 : vector<16x6xf32>
      %73 = arith.addf %67, %72 : vector<16x6xf32>
      %74 = vector.extract_strided_slice %40 {offsets = [0, 4], sizes = [16, 1], strides = [1, 1]} : vector<16x6xf32> to vector<16x1xf32>
      %75 = vector.extract_strided_slice %43 {offsets = [4, 0], sizes = [1, 6], strides = [1, 1]} : vector<6x6xf32> to vector<1x6xf32>
      %76 = vector.broadcast %74 : vector<16x1xf32> to vector<16x6xf32>
      %77 = vector.broadcast %75 : vector<1x6xf32> to vector<16x6xf32>
      %78 = arith.mulf %76, %77 : vector<16x6xf32>
      %79 = arith.addf %73, %78 : vector<16x6xf32>
      %80 = vector.extract_strided_slice %40 {offsets = [0, 5], sizes = [16, 1], strides = [1, 1]} : vector<16x6xf32> to vector<16x1xf32>
      %81 = vector.extract_strided_slice %43 {offsets = [5, 0], sizes = [1, 6], strides = [1, 1]} : vector<6x6xf32> to vector<1x6xf32>
      %82 = vector.broadcast %80 : vector<16x1xf32> to vector<16x6xf32>
      %83 = vector.broadcast %81 : vector<1x6xf32> to vector<16x6xf32>
      %84 = arith.mulf %82, %83 : vector<16x6xf32>
      %85 = arith.addf %79, %84 : vector<16x6xf32>
      %c2_i32_30 = arith.constant 2 : i32
      %86 = arith.cmpi slt, %arg0, %c2_i32_30 : i32
      %cst_31 = arith.constant 0.000000e+00 : f32
      %87 = vector.broadcast %cst_31 : f32 to vector<16x6xf32>
      %88 = arith.maximumf %85, %87 : vector<16x6xf32>
      %89 = arith.select %86, %88, %85 : vector<16x6xf32>
      %c0_32 = arith.constant 0 : index
      %c0_33 = arith.constant 0 : index
      %90 = vector.load %arg10[%c0_32, %c0_33] : memref<16x6xf32, #tpu.memory_space<vmem>>, vector<16x6xf32>
      tpu.vector_store %arg10[%c0_32, %c0_33], %89 {strides = array<i32>} : memref<16x6xf32, #tpu.memory_space<vmem>>, vector<16x6xf32>,
    } else {
    }
    %c2_i32 = arith.constant 2 : i32
    %33 = arith.cmpi eq, %arg0, %c2_i32 : i32
    %c0_i32_19 = arith.constant 0 : i32
    %34 = arith.cmpi eq, %arg1, %c0_i32_19 : i32
    %35 = arith.andi %33, %34 : i1
    %36 = arith.extui %35 : i1 to i32
    %c0_i32_20 = arith.constant 0 : i32
    %37 = arith.cmpi ne, %36, %c0_i32_20 : i32
    scf.if %37 {
      %c0_21 = arith.constant 0 : index
      %c0_22 = arith.constant 0 : index
      %38 = vector.load %arg10[%c0_21, %c0_22] : memref<16x6xf32, #tpu.memory_space<vmem>>, vector<16x6xf32>
      %39 = tpu.iota {dimensions = array<i32: 0>} : vector<2x16xi32>
      %c0_23 = arith.constant 0 : index
      %c0_24 = arith.constant 0 : index
      %40 = vector.load %arg6[%c0_23, %c0_24] : memref<1x16xi32, #tpu.memory_space<vmem>>, vector<1x16xi32>
      %41 = vector.broadcast %40 : vector<1x16xi32> to vector<2x16xi32>
      %42 = arith.cmpi eq, %39, %41 : vector<2x16xi32>
      %43 = arith.extui %42 : vector<2x16xi1> to vector<2x16xi32>
      %44 = arith.sitofp %43 : vector<2x16xi32> to vector<2x16xf32>
      %cst_25 = arith.constant dense<0.000000e+00> : vector<2xf32>
      %45 = vector.multi_reduction <add>, %44, %cst_25 [1] : vector<2x16xf32> to vector<2xf32>
      %46 = vector.shape_cast %45 : vector<2xf32> to vector<2x1xf32>
      %cst_26 = arith.constant 1.000000e+00 : f32
      %47 = vector.broadcast %cst_26 : f32 to vector<2x1xf32>
      %48 = arith.maximumf %46, %47 : vector<2x1xf32>
      %49 = vector.broadcast %48 : vector<2x1xf32> to vector<2x16xf32>
      %50 = arith.divf %44, %49 : vector<2x16xf32>
      %cst_27 = arith.constant dense<0.000000e+00> : vector<2x6xf32>
      %51 = tpu.matmul %50, %38, %cst_27 {dimension_numbers = #tpu.dot_dimension_numbers<[1], [0], [0], [1], [0, 0, 1, 1], [], []>} : vector<2x16xf32>, vector<16x6xf32>, vector<2x6xf32> -> vector<2x6xf32>
      %c3 = arith.constant 3 : index
      %c0_28 = arith.constant 0 : index
      %c0_29 = arith.constant 0 : index
      %52 = vector.load %arg7[%c3, %c0_28, %c0_29] : memref<4x6x6xf32, #tpu.memory_space<vmem>>, vector<1x6x6xf32>
      %53 = vector.shape_cast %52 : vector<1x6x6xf32> to vector<6x6xf32>
      %c3_30 = arith.constant 3 : index
      %c0_31 = arith.constant 0 : index
      %c0_32 = arith.constant 0 : index
      %54 = vector.load %arg8[%c3_30, %c0_31, %c0_32] : memref<4x1x6xf32, #tpu.memory_space<vmem>>, vector<1x1x6xf32>
      %55 = vector.shape_cast %54 : vector<1x1x6xf32> to vector<1x6xf32>
      %cst_33 = arith.constant 0.000000e+00 : f32
      %56 = vector.broadcast %cst_33 : f32 to vector<2x6xf32>
      %57 = vector.broadcast %55 : vector<1x6xf32> to vector<2x6xf32>
      %58 = arith.addf %56, %57 : vector<2x6xf32>
      %59 = vector.extract_strided_slice %51 {offsets = [0, 0], sizes = [2, 1], strides = [1, 1]} : vector<2x6xf32> to vector<2x1xf32>
      %60 = vector.extract_strided_slice %53 {offsets = [0, 0], sizes = [1, 6], strides = [1, 1]} : vector<6x6xf32> to vector<1x6xf32>
      %61 = vector.broadcast %59 : vector<2x1xf32> to vector<2x6xf32>
      %62 = vector.broadcast %60 : vector<1x6xf32> to vector<2x6xf32>
      %63 = arith.mulf %61, %62 : vector<2x6xf32>
      %64 = arith.addf %58, %63 : vector<2x6xf32>
      %65 = vector.extract_strided_slice %51 {offsets = [0, 1], sizes = [2, 1], strides = [1, 1]} : vector<2x6xf32> to vector<2x1xf32>
      %66 = vector.extract_strided_slice %53 {offsets = [1, 0], sizes = [1, 6], strides = [1, 1]} : vector<6x6xf32> to vector<1x6xf32>
      %67 = vector.broadcast %65 : vector<2x1xf32> to vector<2x6xf32>
      %68 = vector.broadcast %66 : vector<1x6xf32> to vector<2x6xf32>
      %69 = arith.mulf %67, %68 : vector<2x6xf32>
      %70 = arith.addf %64, %69 : vector<2x6xf32>
      %71 = vector.extract_strided_slice %51 {offsets = [0, 2], sizes = [2, 1], strides = [1, 1]} : vector<2x6xf32> to vector<2x1xf32>
      %72 = vector.extract_strided_slice %53 {offsets = [2, 0], sizes = [1, 6], strides = [1, 1]} : vector<6x6xf32> to vector<1x6xf32>
      %73 = vector.broadcast %71 : vector<2x1xf32> to vector<2x6xf32>
      %74 = vector.broadcast %72 : vector<1x6xf32> to vector<2x6xf32>
      %75 = arith.mulf %73, %74 : vector<2x6xf32>
      %76 = arith.addf %70, %75 : vector<2x6xf32>
      %77 = vector.extract_strided_slice %51 {offsets = [0, 3], sizes = [2, 1], strides = [1, 1]} : vector<2x6xf32> to vector<2x1xf32>
      %78 = vector.extract_strided_slice %53 {offsets = [3, 0], sizes = [1, 6], strides = [1, 1]} : vector<6x6xf32> to vector<1x6xf32>
      %79 = vector.broadcast %77 : vector<2x1xf32> to vector<2x6xf32>
      %80 = vector.broadcast %78 : vector<1x6xf32> to vector<2x6xf32>
      %81 = arith.mulf %79, %80 : vector<2x6xf32>
      %82 = arith.addf %76, %81 : vector<2x6xf32>
      %83 = vector.extract_strided_slice %51 {offsets = [0, 4], sizes = [2, 1], strides = [1, 1]} : vector<2x6xf32> to vector<2x1xf32>
      %84 = vector.extract_strided_slice %53 {offsets = [4, 0], sizes = [1, 6], strides = [1, 1]} : vector<6x6xf32> to vector<1x6xf32>
      %85 = vector.broadcast %83 : vector<2x1xf32> to vector<2x6xf32>
      %86 = vector.broadcast %84 : vector<1x6xf32> to vector<2x6xf32>
      %87 = arith.mulf %85, %86 : vector<2x6xf32>
      %88 = arith.addf %82, %87 : vector<2x6xf32>
      %89 = vector.extract_strided_slice %51 {offsets = [0, 5], sizes = [2, 1], strides = [1, 1]} : vector<2x6xf32> to vector<2x1xf32>
      %90 = vector.extract_strided_slice %53 {offsets = [5, 0], sizes = [1, 6], strides = [1, 1]} : vector<6x6xf32> to vector<1x6xf32>
      %91 = vector.broadcast %89 : vector<2x1xf32> to vector<2x6xf32>
      %92 = vector.broadcast %90 : vector<1x6xf32> to vector<2x6xf32>
      %93 = arith.mulf %91, %92 : vector<2x6xf32>
      %94 = arith.addf %88, %93 : vector<2x6xf32>
      %c0_34 = arith.constant 0 : index
      %c0_35 = arith.constant 0 : index
      %95 = vector.load %arg9[%c0_34, %c0_35] : memref<2x6xf32, #tpu.memory_space<vmem>>, vector<2x6xf32>
      tpu.vector_store %arg9[%c0_34, %c0_35], %94 {strides = array<i32>} : memref<2x6xf32, #tpu.memory_space<vmem>>, vector<2x6xf32>,
    } else {
    }
    return
  }
  func.func @transform_0(%arg0: i32, %arg1: i32) -> (i32, i32) {
    %c0_i32 = arith.constant 0 : i32
    %c0_i32_0 = arith.constant 0 : i32
    return %arg1, %c0_i32 : i32, i32
  }
  func.func @transform_1(%arg0: i32, %arg1: i32) -> (i32, i32) {
    %c0_i32 = arith.constant 0 : i32
    %c0_i32_0 = arith.constant 0 : i32
    return %c0_i32, %arg1 : i32, i32
  }
  func.func @transform_2(%arg0: i32, %arg1: i32) -> (i32, i32) {
    %c0_i32 = arith.constant 0 : i32
    %c0_i32_0 = arith.constant 0 : i32
    return %arg1, %c0_i32 : i32, i32
  }
  func.func @transform_3(%arg0: i32, %arg1: i32) -> (i32, i32) {
    %c0_i32 = arith.constant 0 : i32
    %c0_i32_0 = arith.constant 0 : i32
    %c0_i32_1 = arith.constant 0 : i32
    return %c0_i32, %c0_i32_0 : i32, i32
  }
  func.func @transform_4(%arg0: i32, %arg1: i32) -> (i32, i32) {
    %c0_i32 = arith.constant 0 : i32
    %c0_i32_0 = arith.constant 0 : i32
    %c0_i32_1 = arith.constant 0 : i32
    return %c0_i32, %c0_i32_0 : i32, i32
  }
  func.func @transform_5(%arg0: i32, %arg1: i32) -> (i32, i32, i32) {
    %c0_i32 = arith.constant 0 : i32
    %c0_i32_0 = arith.constant 0 : i32
    %c0_i32_1 = arith.constant 0 : i32
    %c0_i32_2 = arith.constant 0 : i32
    return %c0_i32, %c0_i32_0, %c0_i32_1 : i32, i32, i32
  }
  func.func @transform_6(%arg0: i32, %arg1: i32) -> (i32, i32, i32) {
    %c0_i32 = arith.constant 0 : i32
    %c0_i32_0 = arith.constant 0 : i32
    %c0_i32_1 = arith.constant 0 : i32
    %c0_i32_2 = arith.constant 0 : i32
    return %c0_i32, %c0_i32_0, %c0_i32_1 : i32, i32, i32
  }
  func.func @transform_7(%arg0: i32, %arg1: i32) -> (i32, i32) {
    %c0_i32 = arith.constant 0 : i32
    %c0_i32_0 = arith.constant 0 : i32
    %c0_i32_1 = arith.constant 0 : i32
    return %c0_i32, %c0_i32_0 : i32, i32
  }
}

</mosaic_0001>

<bundles_post_ra>
// kernel: gn_forward.1
= control target key start
LH: loop header
LB: loop body
LE: loop exit
PB: predicated region body
PF: predicated region fallthrough
CT: control target
= control target key end

     0   :  { %s926_s24 = smov 0   ;;  %s928_s25 = smov 0   ;;  %s1048_s0 = inlined_call_operand.vmem [shape: s32[32,1], index: 0, kind: input, shape index: {}]   ;;  %s1049_s1 = inlined_call_operand.vmem [shape: s32[1,32], index: 1, kind: input, shape index: {}]   ;;  %s1050_s2 = inlined_call_operand.vmem [shape: f32[32,6], index: 2, kind: input, shape index: {}]   ;;  %s1051_s3 = inlined_call_operand.vmem [shape: f32[16,6], index: 3, kind: input, shape index: {}]   ;;  %s1052_s4 = inlined_call_operand.vmem [shape: s32[1,16], index: 4, kind: input, shape index: {}]   ;;  %s1053_s5 = inlined_call_operand.vmem [shape: f32[4,6,6], index: 5, kind: input, shape index: {}]   ;;  %s1054_s6 = inlined_call_operand.vmem [shape: f32[4,1,6], index: 6, kind: input, shape index: {}]   ;;  %s1055_s7 = inlined_call_operand.vmem [shape: f32[2,6], index: 7, kind: output, shape index: {}]  }
   0x1   :  { %s930_s26 = smov 0  }
   0x2 LB: > { %s29_s27 = sadd.s32 1, %s866_s25  ;;  %p752_p0 = scmp.ge.s32.totalorder %s870_s26, 1  ;;  %s870_s26 = sphi %s930_s26, %s17_s26   ;;  %s866_s25 = sphi %s928_s25, %s1057_s25   ;;  %s862_s24 = sphi %s926_s24, %s1056_s24  }
   0x3   : > { %p31_p1 = scmp.ge.s32.totalorder %s29_s27, 3  ;;  %p264_p2 = scmp.lt.s32.totalorder %s870_s26, 4 }
   0x5   : > { %s1059_s27 = smov (%p31_p1, %s29_s27), 0  ;;  %p265_p3 = pnand %p752_p0, %p264_p2 }
   0x6   : > { %p314_p4 = scmp.eq.s32.totalorder (!%p265_p3), %s862_s24, 0 }
   0x7   : > { %268 = sbr.rel (%p265_p3) target bundleno = 877 (0x36d), region = 48 }
   0xc   : > { %319 = sbr.rel (!%p314_p4) target bundleno = 17 (0x11), region = 52  ;;  %v320_v0 = vld [vmem:[%s1051_s3] sm:$0xff] (%p314_p4)  ;;  %vm322_vm0 = vcmask (%p314_p4), 48128   ;;  %v321_v1 = vld [vmem:[%s1051_s3 + $0x8] sm:$0xff] (%p314_p4) }
   0xd   : > { %323 = vst.msk [vmem:[#allocation2] sm:$0xff] (%p314_p4), %vm322_vm0, %v320_v0 }
   0xe   : > { %324 = vst.msk [vmem:[#allocation2 + $0x8] sm:$0xff] (%p314_p4), %vm322_vm0, %v321_v1 }
  0x11 PF: > { %v337_v2 = vld [vmem:[%s1048_s0 + $0x10] sm:$0xff]  ;;  %v335_v3 = vld [vmem:[%s1048_s0] sm:$0xff]  ;;  %v872_v4 = vmov 0   ;;  %v338_v5 = vld [vmem:[%s1048_s0 + $0x18] sm:$0xff]  ;;  %v333_v9 = vlaneseq  ;;  %vm367_vm1 = vcmask 130048   ;;  %v873_v13 = vmov 0.0   ;;  %s473_s10 = scalar_lea.vmem %s1054_s6, %s862_s24 }
  0x12   : > { %820 = vset.pattern.permute.xlu0 %v872_v4  ;;  %821 = vset.pattern.permute.xlu1 %v872_v4  ;;  %v336_v6 = vld [vmem:[%s1048_s0 + $0x8] sm:$0xff]  ;;  %vm328_vm6 = vcmask 48128   ;;  %v365_v22 = vld [vmem:[%s1050_s2 + $0x10] sm:$0xff]  ;;  %v366_v23 = vld [vmem:[%s1050_s2 + $0x18] sm:$0xff]  ;;  %vm426_vm9 = vcmask 261120   ;;  %v874_v41 = vmov 1  }
  0x13   : > { %346 = vperm.xlu0 %820, %v337_v2   ;;  %340 = vperm.xlu1 %821, %v335_v3   ;;  %v334_v10 = vand.u32 127, %v333_v9  ;;  %329 = vst.msk [vmem:[#allocation3] sm:$0xff] %vm328_vm6, %v873_v13  ;;  %v988_v24 = vshrl.u32 %v333_v9, 7  ;;  %v364_v25 = vld [vmem:[%s1050_s2 + $0x8] sm:$0xff]  ;;  %v363_v30 = vld [vmem:[%s1050_s2] sm:$0xff]  ;;  %v875_v52 = vmov 3  }
  0x14   : > { %822 = vset.pattern.permute.xlu2 %v872_v4  ;;  %v972_v8 = vld [vmem:[#allocation2] sm:$0xff]  ;;  %330 = vst.msk [vmem:[#allocation3 + $0x8] sm:$0xff] %vm328_vm6, %v873_v13  ;;  %v876_v53 = vmov 2   ;;  %v877_v54 = vmov 5   ;;  %v878_v55 = vmov 4   ;;  %p569_p5 = scmp.eq.s32.totalorder %s862_s24, 2 }
  0x15   : > { %v968_v7 = vld [vmem:[#allocation2 + $0x8] sm:$0xff]  ;;  %v835_v31 = vld [vmem:[%s1049_s1] ss:$0 sm:$0xff]  ;;  %v415_v32 = vadd.s32 8, %v988_v24  ;;  %s766_s11 = sshll.u32 %s862_s24, 3  ;;  %p559_p6 = scmp.lt.s32.totalorder %s862_s24, 2 }
  0x16   : > { %776 = vmatpush.msra.mxu2 %v968_v7  ;;  %394 = vmatpush.msra.mxu0 %v968_v7  ;;  %vm418_vm7 = vcmp.eq.s32.totalorder %v988_v24, %v835_v31  ;;  %s471_s14 = scalar_lea.vmem %s1053_s5, %s766_s11  ;;  %v836_v1 = vld [vmem:[%s473_s10] ss:$0 sm:$0xff]  ;;  %vm581_vm11 = vcmask (%p569_p5), 123904  }
  0x17   : > { %vm419_vm8 = vcmp.eq.s32.totalorder %v415_v32, %v835_v31  ;;  %v762_v39 = vsel %vm418_vm7, 1.0, %v873_v13  ;;  %v472_v59 = vld [vmem:[%s471_s14] sm:$0x3f]  ;;  %s562_s17 = scalar_select %p559_p6, 1, 0 }
  0x18   : > { %777 = vmatpush.msra.mxu2 %v972_v8  ;;  %395 = vmatpush.msra.mxu0 %v972_v8  ;;  %v763_v40 = vsel %vm419_vm8, 1.0, %v873_v13  ;;  %v489_v62 = vperm.slane %v472_v59, 0  ;;  %v502_v2 = vperm.slane %v472_v59, 1  ;;  %v528_v9 = vperm.slane %v472_v59, 3 }
  0x1a   : > { %v424_v42 = vld [vmem:[#allocation3] sm:$0xff] }
  0x1b   : > { %349 = vperm.xlu0 %820, %v338_v5   ;;  %343 = vperm.xlu1 %821, %v336_v6   ;;  %v425_v45 = vld [vmem:[#allocation3 + $0x8] sm:$0xff]  ;;  %v515_v6 = vperm.slane %v472_v59, 2 }
  0x23   : > { %823 = vset.pattern.permute.xlu0 %v874_v41  ;;  %827 = vset.pattern.permute.xlu1 %v874_v41 }
  0x85   : > { %v347_v11 = vpop.permute.xlu0 %346  ;;  %v341_v12 = vpop.permute.xlu1 %340 }
  0x86   : > { %vm353_vm2 = vcmp.eq.s32.totalorder %v334_v10, %v347_v11  ;;  %vm351_vm3 = vcmp.eq.s32.totalorder %v334_v10, %v341_v12  ;;  %v541_v11 = vperm.slane %v472_v59, 4 }
  0x87   : > { %v756_v14 = vsel %vm353_vm2, 1.0, %v873_v13  ;;  %v754_v15 = vsel %vm351_vm3, 1.0, %v873_v13 }
  0x88   : > { %760 = vmatmul.msk.f32.vlgmr.msra.gmra.mxu2 %vm367_vm1, %v756_v14  ;;  %758 = vmatmul.msk.f32.vlgmr.msra.gmra.mxu0 %vm367_vm1, %v754_v15 }
  0x8d   : > { %v350_v16 = vpop.permute.xlu0 %349  ;;  %v344_v17 = vpop.permute.xlu1 %343 }
  0x8e   : > { %vm354_vm4 = vcmp.eq.s32.totalorder %v334_v10, %v350_v16  ;;  %vm352_vm5 = vcmp.eq.s32.totalorder %v334_v10, %v344_v17  ;;  %v554_v16 = vperm.slane %v472_v59, 5 }
  0x8f   : > { %v757_v18 = vsel %vm354_vm4, 1.0, %v873_v13  ;;  %v755_v19 = vsel %vm352_vm5, 1.0, %v873_v13 }
  0x90   : > { %761 = vmatmul.msk.f32.gmra.mxu2 %vm367_vm1, %v757_v18  ;;  %759 = vmatmul.msk.f32.gmra.mxu0 %vm367_vm1, %v755_v19 }
 0x105   : > { %v397_v20 = vpop.f32.mrf.mxu0 }
 0x106   : > { %v398_v35 = vadd.f32 %v397_v20, %v363_v30 }
 0x108   : > { %v409_v38 = vmax.f32 %v398_v35, 0.0 }
 0x10b   : > { %v403_v21 = vpop.f32.mrf.mxu2 }
 0x10c   : > { %v404_v28 = vadd.f32 %v403_v21, %v365_v22 }
 0x10d   : > { %v400_v26 = vpop.f32.mrf.mxu0 }
 0x10e   : > { %v401_v33 = vadd.f32 %v400_v26, %v364_v25  ;;  %v411_v36 = vmax.f32 %v404_v28, 0.0 }
 0x110   : > { %v410_v37 = vmax.f32 %v401_v33, 0.0 }
 0x113   : > { %v406_v27 = vpop.f32.mrf.mxu2 }
 0x114   : > { %v407_v29 = vadd.f32 %v406_v27, %v366_v23  ;;  %v563_v23 = vstv %s562_s17 }
 0x115   : > { %vm564_vm10 = vcmp.eq.s32.totalorder %v563_v23, 1 }
 0x116   : > { %v412_v34 = vmax.f32 %v407_v29, 0.0 }
 0x118   : > { %445 = vmatpush.msra.mxu1 %v412_v34  ;;  %778 = vmatpush.msra.mxu3 %v412_v34 }
 0x11a   : > { %446 = vmatpush.msra.mxu1 %v411_v36  ;;  %779 = vmatpush.msra.mxu3 %v411_v36 }
 0x11c   : > { %447 = vmatpush.msra.mxu1 %v410_v37  ;;  %780 = vmatpush.msra.mxu3 %v410_v37 }
 0x11e   : > { %448 = vmatpush.msra.mxu1 %v409_v38  ;;  %781 = vmatpush.msra.mxu3 %v409_v38 }
 0x11f   : > { %764 = vmatmul.msk.f32.vlgmr.msra.gmra.mxu1 %vm426_vm9, %v762_v39  ;;  %765 = vmatmul.msk.f32.vlgmr.msra.gmra.mxu3 %vm426_vm9, %v763_v40 }
 0x19c   : > { %v450_v43 = vpop.f32.mrf.mxu1 }
 0x19d   : > { %v456_v44 = vadd.f32 %v450_v43, %v424_v42  ;;  %v844_v42 = vld [vmem:[%s1052_s4] ss:$0 sm:$0xff] (%p569_p5)  ;;  %v879_v43 = vmov (%p569_p5), 0.0  }
 0x19e   : > { %vm578_vm12 = vcmp.eq.s32.totalorder (%p569_p5), %v988_v24, %v844_v42 }
 0x19f   : > { %459 = vst.msk [vmem:[#allocation3] sm:$0xff] %vm328_vm6, %v456_v44  ;;  %v768_v44 = vsel (%p569_p5), %vm578_vm12, 1.0, %v879_v43 }
 0x1a2   : > { %v453_v46 = vpop.f32.mrf.mxu3 }
 0x1a3   : > { %v457_v47 = vadd.f32 %v453_v46, %v425_v45  ;;  %v582_v45 = vsel (%p569_p5), %vm581_vm11, %v768_v44, 0.0 }
 0x1a5   : > { %460 = vst.msk [vmem:[#allocation3 + $0x8] sm:$0xff] %vm328_vm6, %v457_v47 }
 0x1a6   : > { %v466_v48 = vld [vmem:[#allocation3] sm:$0xff] }
 0x1a7   : > { %v468_v49 = vadd.f32 %v466_v48, %v972_v8  ;;  %v880_v48 = vmov (%p569_p5), 3  }
 0x1a9   : > { %495 = vperm.xlu0 %823, %v468_v49   ;;  %481 = vperm.xlu2 %822, %v468_v49  }
 0x1ac   : > { %v467_v50 = vld [vmem:[#allocation3 + $0x8] sm:$0xff] }
 0x1ad   : > { %v469_v51 = vadd.f32 %v467_v50, %v968_v7  ;;  %v882_v50 = vmov (%p569_p5), 0  }
 0x1af   : > { %499 = vperm.xlu1 %827, %v469_v51  }
 0x1b1   : > { %829 = vset.pattern.permute.xlu0 %v875_v52  ;;  %824 = vset.pattern.permute.xlu2 %v876_v53 }
 0x1b2   : > { %525 = vperm.xlu0 %829, %v469_v51   ;;  %508 = vperm.xlu2 %824, %v468_v49  }
 0x1b7   : > { %828 = vset.pattern.permute.xlu1 %v876_v53 }
 0x1b8   : > { %512 = vperm.xlu1 %828, %v469_v51  }
 0x1ba   : > { %825 = vset.pattern.permute.xlu2 %v875_v52  ;;  %834 = vset.pattern.permute.xlu0 %v877_v54 }
 0x1bb   : > { %521 = vperm.xlu2 %825, %v468_v49   ;;  %837 = vset.pattern.permute.xlu0 (%p569_p5), %v882_v50 }
 0x1c0   : > { %830 = vset.pattern.permute.xlu1 %v878_v55 }
 0x1c1   : > { %534 = vperm.xlu1 %830, %v468_v49  }
 0x1c3   : > { %826 = vset.pattern.permute.xlu2 %v872_v4 }
 0x1c4   : > { %486 = vperm.xlu2 %826, %v469_v51  }
 0x1c9   : > { %832 = vset.pattern.permute.xlu1 %v877_v54 }
 0x1ca   : > { %547 = vperm.xlu1 %832, %v468_v49   ;;  %v881_v49 = vmov (%p569_p5), 1  }
 0x1cc   : > { %831 = vset.pattern.permute.xlu2 %v878_v55 }
 0x1cd   : > { %538 = vperm.xlu2 %831, %v469_v51  }
 0x1d2   : > { %838 = vset.pattern.permute.xlu1 (%p569_p5), %v881_v49 }
 0x1d5   : > { %833 = vset.pattern.permute.xlu2 %v877_v54 }
 0x1d6   : > { %551 = vperm.xlu2 %833, %v469_v51  }
 0x1dc   : > { %583 = vadd.xlane.f32.xlu0 (%p569_p5), %v582_v45 }
 0x1de   : > { %840 = vset.pattern.permute.xlu2 (%p569_p5), %v880_v48 }
 0x203   : > { %v482_v56 = vpop.permute.xlu2 %481 }
 0x204   : > { %v490_v13 = vmul.f32 %v489_v62, %v482_v56 }
 0x206   : > { %v492_v21 = vadd.f32 %v836_v1, %v490_v13 }
 0x20c   : > { %v509_v57 = vpop.permute.xlu2 %508 }
 0x20d   : > { %v516_v29 = vmul.f32 %v515_v6, %v509_v57 }
 0x215   : > { %v522_v58 = vpop.permute.xlu2 %521 }
 0x216   : > { %v529_v33 = vmul.f32 %v528_v9, %v522_v58 }
 0x21b   : > { %v496_v61 = vpop.permute.xlu0 %495 }
 0x21c   : > { %v503_v17 = vmul.f32 %v502_v2, %v496_v61 }
 0x21e   : > { %v487_v60 = vpop.permute.xlu2 %486  ;;  %v505_v26 = vadd.f32 %v503_v17, %v492_v21 }
 0x21f   : > { %v491_v0 = vmul.f32 %v489_v62, %v487_v60 }
 0x220   : > { %v518_v31 = vadd.f32 %v516_v29, %v505_v26 }
 0x221   : > { %v500_v63 = vpop.permute.xlu1 %499  ;;  %v493_v3 = vadd.f32 %v836_v1, %v491_v0  ;;  %v883_v0 = vmov (%p569_p5), 4   ;;  %v884_v1 = vmov (%p569_p5), 2  }
 0x222   : > { %v504_v4 = vmul.f32 %v502_v2, %v500_v63  ;;  %v531_v35 = vadd.f32 %v529_v33, %v518_v31  ;;  %v885_v2 = vmov (%p569_p5), 5  }
 0x224   : > { %v526_v7 = vpop.permute.xlu0 %525  ;;  %v506_v10 = vadd.f32 %v504_v4, %v493_v3  ;;  %v770_v3 = vld [vmem:[%s1053_s5 + $0x18] sm:$0x3f] (%p569_p5) }
 0x225   : > { %v530_v14 = vmul.f32 %v528_v9, %v526_v7  ;;  %v637_v4 = vperm.slane (%p569_p5), %v770_v3, 0  ;;  %v845_v7 = vld [vmem:[%s1054_s6 + $0x3] ss:$0 sm:$0xff] (%p569_p5)  ;;  %v672_v23 = vperm.slane (%p569_p5), %v770_v3, 5 }
 0x227   : > { %v539_v5 = vpop.permute.xlu2 %538 }
 0x228   : > { %v543_v18 = vmul.f32 %v541_v11, %v539_v5 }
 0x22a   : > { %v513_v8 = vpop.permute.xlu1 %512 }
 0x22b   : > { %v517_v12 = vmul.f32 %v515_v6, %v513_v8 }
 0x22d   : > { %v519_v15 = vadd.f32 %v517_v12, %v506_v10  ;;  %v644_v10 = vperm.slane (%p569_p5), %v770_v3, 1  ;;  %v651_v12 = vperm.slane (%p569_p5), %v770_v3, 2 }
 0x22f   : > { %v532_v19 = vadd.f32 %v530_v14, %v519_v15  ;;  %v658_v14 = vperm.slane (%p569_p5), %v770_v3, 3 }
 0x230   : > { %v552_v20 = vpop.permute.xlu2 %551 }
 0x231   : > { %v545_v22 = vadd.f32 %v543_v18, %v532_v19  ;;  %v556_v25 = vmul.f32 %v554_v16, %v552_v20  ;;  %v665_v20 = vperm.slane (%p569_p5), %v770_v3, 4 }
 0x233   : > { %v558_v27 = vadd.f32 %v556_v25, %v545_v22  ;;  %v535_v28 = vpop.permute.xlu1 %534 }
 0x234   : > { %v542_v34 = vmul.f32 %v541_v11, %v535_v28 }
 0x235   : > { %v561_v30 = vmax.f32 %v558_v27, 0.0 }
 0x236   : > { %v544_v37 = vadd.f32 %v542_v34, %v531_v35 }
 0x237   : > { %v566_v32 = vsel %vm564_vm10, %v561_v30, %v558_v27 }
 0x238   : > { %568 = vst.msk [vmem:[#allocation2 + $0x8] sm:$0xff] %vm328_vm6, %v566_v32 }
 0x23c   : > { %v548_v36 = vpop.permute.xlu1 %547 }
 0x23d   : > { %v555_v38 = vmul.f32 %v554_v16, %v548_v36 }
 0x23f   : > { %v557_v39 = vadd.f32 %v555_v38, %v544_v37  ;;  %v575_v46 = vld [vmem:[#allocation2 + $0x8] sm:$0xff] (%p569_p5) }
 0x240   : > { %573 = sbr.rel (!%p569_p5) target bundleno = 877 (0x36d), region = 64  ;;  %618 = vmatpush.msra.mxu0 (%p569_p5), %v575_v46 }
 0x241   : > { %v560_v40 = vmax.f32 %v557_v39, 0.0 }
 0x243   : > { %v565_v41 = vsel %vm564_vm10, %v560_v40, %v557_v39 }
 0x244   : > { %567 = vst.msk [vmem:[#allocation2] sm:$0xff] %vm328_vm6, %v565_v41 }
 0x24b   : > { %v574_v47 = vld [vmem:[#allocation2] sm:$0xff] }
 0x24c   : > { %619 = vmatpush.msra.mxu0 %v574_v47 }
 0x24f   : > { %v584_v51 = vpop.xlane.xlu0 %583 }
 0x250   : > { %v585_v52 = vmax.f32 %v584_v51, 1.0 }
 0x252   : > { %846 = vrcp.f32 %v585_v52  ;;  %v597_v55 = vand.u32 2147483648, %v585_v52  ;;  %v595_v57 = vand.u32 2147483647, %v585_v52  ;;  %vm591_vm14 = vweird.f32 %v585_v52 }
 0x254   : > { %v598_v59 = vor.u32 1.1754944e-38, %v597_v55  ;;  %vm596_vm0 = vcmp.eq.f32.partialorder %v595_v57, 8.507059e+37 }
 0x258   : > { %v847_v53 = vpop.eup %846 }
 0x259   : > { %v587_v54 = vmul.f32 %v847_v53, %v585_v52  ;;  %vm592_vm13 = vweird.f32 %v847_v53 }
 0x25a   : > { %vm593_vm15 = vmor %vm591_vm14, %vm592_vm13 }
 0x25b   : > { %v588_v24 = vsub.f32 1.0, %v587_v54 }
 0x25d   : > { %v589_v56 = vmul.f32 %v847_v53, %v588_v24 }
 0x25f   : > { %v590_v58 = vadd.f32 %v847_v53, %v589_v56 }
 0x261   : > { %v594_v60 = vsel %vm593_vm15, %v847_v53, %v590_v58 }
 0x262   : > { %v599_v61 = vsel %vm596_vm0, %v598_v59, %v594_v60 }
 0x263   : > { %v600_v62 = vmul.f32 %v768_v44, %v599_v61 }
 0x265   : > { %769 = vmatmul.msk.f32.vlgmr.msra.gmra.mxu0 %vm367_vm1, %v600_v62  ;;  %vm675_vm1 = vcmask 41984  }
 0x2e2   : > { %v621_v63 = vpop.f32.mrf.mxu0 }
 0x2e3   : > { %655 = vperm.xlu2 %840, %v621_v63   ;;  %641 = vperm.xlu1 %838, %v621_v63  }
 0x2e4   : > { %634 = vperm.xlu0 %837, %v621_v63  }
 0x2eb   : > { %841 = vset.pattern.permute.xlu2 %v883_v0  ;;  %839 = vset.pattern.permute.xlu1 %v884_v1 }
 0x2ec   : > { %662 = vperm.xlu2 %841, %v621_v63   ;;  %648 = vperm.xlu1 %839, %v621_v63  }
 0x2ed   : > { %843 = vset.pattern.permute.xlu0 %v885_v2 }
 0x2f4   : > { %842 = vset.pattern.permute.xlu1 %v885_v2 }
 0x2f5   : > { %669 = vperm.xlu1 %842, %v621_v63  }
 0x33d   : > { %v656_v9 = vpop.permute.xlu2 %655 }
 0x33e   : > { %v659_v19 = vmul.f32 %v658_v14, %v656_v9 }
 0x346   : > { %v663_v21 = vpop.permute.xlu2 %662 }
 0x347   : > { %v666_v25 = vmul.f32 %v665_v20, %v663_v21 }
 0x355   : > { %v642_v5 = vpop.permute.xlu1 %641 }
 0x356   : > { %v635_v6 = vpop.permute.xlu0 %634  ;;  %v645_v13 = vmul.f32 %v644_v10, %v642_v5 }
 0x357   : > { %v638_v8 = vmul.f32 %v637_v4, %v635_v6 }
 0x359   : > { %v639_v11 = vadd.f32 %v845_v7, %v638_v8 }
 0x35b   : > { %v646_v16 = vadd.f32 %v645_v13, %v639_v11 }
 0x35e   : > { %v649_v15 = vpop.permute.xlu1 %648 }
 0x35f   : > { %v652_v17 = vmul.f32 %v651_v12, %v649_v15 }
 0x361   : > { %v653_v18 = vadd.f32 %v652_v17, %v646_v16 }
 0x363   : > { %v660_v22 = vadd.f32 %v659_v19, %v653_v18 }
 0x365   : > { %v667_v27 = vadd.f32 %v666_v25, %v660_v22 }
 0x367   : > { %v670_v26 = vpop.permute.xlu1 %669 }
 0x368   : > { %v673_v28 = vmul.f32 %v672_v23, %v670_v26 }
 0x36a   : > { %v674_v29 = vadd.f32 %v673_v28, %v667_v27 }
 0x36c   : > { %676 = vst.msk [vmem:[%s1055_s7] sm:$0x3] %vm675_vm1, %v674_v29 }
 0x36d PF: > { %s17_s26 = sadd.s32 1, %s870_s26   ;;  %s1056_s24 = smov %s866_s25 }
 0x36e   : > { %p14_p7 = scmp.ge.s32.totalorder %s17_s26, 5   ;;  %s1057_s25 = smov %s1059_s27 }
 0x370   :  { %16 = sbr.rel (!%p14_p7) target bundleno = 2 (0x2), region = 100 }

</bundles_post_ra>
